<compile_context>
chip_gen: v5e
topology: v5e:2x2
jax: 0.10.0
libtpu: 0.0.40
codegen_flags: <defaults>
</compile_context>

<pallas_src>
import jax
import jax.numpy as jnp
from jax.experimental import pallas as pl
from jax.experimental.pallas import tpu as pltpu


def model2_kernel(x_ref, vecs_ref, ws_ref, w4_ref, o_ref):
    # x:    (B, S, D) f32, D on lanes
    # vecs: (5, D)  rows = [q, b1, b2, b3, b4(padded to D)]
    # ws:   (3, D, H) = [w1, w2, w3] (requires input_size == hidden_size)
    # w4:   (H, out)
    x = x_ref[...]
    q = vecs_ref[0:1, :]                                   # (1, D), kept 2-D

    # Attention scores in (B, S, 1) layout: sublane softmax, no relayout.
    scores = jnp.sum(x * q[None, :, :], axis=-1, keepdims=True)     # (B, S, 1)
    m = jnp.max(scores, axis=1, keepdims=True)                       # (B, 1, 1)
    e = jnp.exp(scores - m)                                          # (B, S, 1)
    att = e / jnp.sum(e, axis=1, keepdims=True)                      # (B, S, 1)
    pooled = jnp.sum(att * x, axis=1)                                # (B, D)

    # MLP: 3x (Linear -> ReLU) -> Linear -> Sigmoid
    h = jnp.maximum(
        jnp.dot(pooled, ws_ref[0], preferred_element_type=jnp.float32)
        + vecs_ref[1:2, :], 0.0)
    h = jnp.maximum(
        jnp.dot(h, ws_ref[1], preferred_element_type=jnp.float32)
        + vecs_ref[2:3, :], 0.0)
    h = jnp.maximum(
        jnp.dot(h, ws_ref[2], preferred_element_type=jnp.float32)
        + vecs_ref[3:4, :], 0.0)

    out_size = o_ref.shape[-1]
    z = (jnp.dot(h, w4_ref[...], preferred_element_type=jnp.float32)
         + vecs_ref[4:5, :out_size])
    o_ref[...] = jax.nn.sigmoid(z)                                   # (B, out)


def pack_params(params):
    """Pack the 9 small parameter arrays into 3 kernel inputs (done once)."""
    D = params["q"].shape[1]
    out_size = params["w4"].shape[1]
    b4_padded = jnp.zeros((1, D), jnp.float32).at[:, :out_size].set(params["b4"])
    vecs = jnp.concatenate(
        [params["q"], params["b1"], params["b2"], params["b3"], b4_padded],
        axis=0)                                            # (5, D)
    ws = jnp.stack([params["w1"], params["w2"], params["w3"]], axis=0)  # (3, D, H)
    return vecs, ws, params["w4"]


def model2_forward(x, vecs, ws, w4):
    B, S, D = x.shape
    H = ws.shape[2]
    out_size = w4.shape[1]

    vmem = pl.BlockSpec(memory_space=pltpu.MemorySpace.VMEM)
    cost = pl.CostEstimate(
        flops=4 * B * S * D + 2 * B * (D * H + 2 * H * H + H * out_size),
        transcendentals=B * S + B * out_size,
        bytes_accessed=4 * (x.size + vecs.size + ws.size + w4.size + B * out_size),
    )
    return pl.pallas_call(
        model2_kernel,
        out_shape=jax.ShapeDtypeStruct((B, out_size), jnp.float32),
        in_specs=[vmem, vmem, vmem, vmem],
        out_specs=vmem,
        cost_estimate=cost,
    )(x, vecs, ws, w4)


def init_params(key, input_size, hidden_size, output_size):
    ks = jax.random.split(key, 9)
    # Weights stored transposed vs nn.Linear: (in_features, out_features).
    return {
        "q":  jax.random.normal(ks[0], (1, input_size), jnp.float32),
        "w1": jax.random.normal(ks[1], (input_size, hidden_size), jnp.float32) * 0.1,
        "b1": jax.random.normal(ks[2], (1, hidden_size), jnp.float32) * 0.1,
        "w2": jax.random.normal(ks[3], (hidden_size, hidden_size), jnp.float32) * 0.1,
        "b2": jax.random.normal(ks[4], (1, hidden_size), jnp.float32) * 0.1,
        "w3": jax.random.normal(ks[5], (hidden_size, hidden_size), jnp.float32) * 0.1,
        "b3": jax.random.normal(ks[6], (1, hidden_size), jnp.float32) * 0.1,
        "w4": jax.random.normal(ks[7], (hidden_size, output_size), jnp.float32) * 0.1,
        "b4": jax.random.normal(ks[8], (1, output_size), jnp.float32) * 0.1,
    }


def reference_forward(x, p):
    # Pure-JAX reference of the PyTorch forward, for correctness checking.
    scores = jnp.einsum("bsd,d->bs", x, p["q"][0])
    att = jax.nn.softmax(scores, axis=1)
    pooled = jnp.sum(att[:, :, None] * x, axis=1)
    h = jax.nn.relu(pooled @ p["w1"] + p["b1"])
    h = jax.nn.relu(h @ p["w2"] + p["b2"])
    h = jax.nn.relu(h @ p["w3"] + p["b3"])
    return jax.nn.sigmoid(h @ p["w4"] + p["b4"])


if __name__ == "__main__":
    input_size = 50
    hidden_size = 50
    output_size = 1
    batch = 2
    seq_len = 8

    key = jax.random.PRNGKey(0)
    k_x, k_p = jax.random.split(key)
    x = jax.random.normal(k_x, (batch, seq_len, input_size), jnp.float32)
    params = init_params(k_p, input_size, hidden_size, output_size)

    vecs, ws, w4 = pack_params(params)      # packed once, outside the kernel
    out = model2_forward(x, vecs, ws, w4)
    out = jax.block_until_ready(out)

    ref = reference_forward(x, params)
    assert out.shape == (batch, output_size)
    assert jnp.allclose(out, ref, atol=1e-5, rtol=1e-5), (out, ref)

    print("KERNEL_OK")
</pallas_src>

<mosaic_0001>
module attributes {stable_mosaic.version = 11 : i64} {
  func.func @model2_kernel(%arg0: memref<2x8x50xf32, #tpu.memory_space<vmem>>, %arg1: memref<5x50xf32, #tpu.memory_space<vmem>>, %arg2: memref<3x50x50xf32, #tpu.memory_space<vmem>>, %arg3: memref<50x1xf32, #tpu.memory_space<vmem>>, %arg4: memref<2x1xf32, #tpu.memory_space<vmem>>) attributes {dimension_semantics = [], scalar_prefetch = 0 : i64, scratch_operands = 0 : i64, tpu.core_type = #tpu.core_type<tc>} {
    %c0 = arith.constant 0 : index
    %c0_0 = arith.constant 0 : index
    %c0_1 = arith.constant 0 : index
    %0 = vector.load %arg0[%c0, %c0_0, %c0_1] : memref<2x8x50xf32, #tpu.memory_space<vmem>>, vector<2x8x50xf32>
    %c0_2 = arith.constant 0 : index
    %c0_3 = arith.constant 0 : index
    %1 = vector.load %arg1[%c0_2, %c0_3] : memref<5x50xf32, #tpu.memory_space<vmem>>, vector<1x50xf32>
    %2 = vector.shape_cast %1 : vector<1x50xf32> to vector<1x1x50xf32>
    %3 = vector.broadcast %2 : vector<1x1x50xf32> to vector<2x8x50xf32>
    %4 = arith.mulf %0, %3 : vector<2x8x50xf32>
    %cst = arith.constant dense<0.000000e+00> : vector<2x8xf32>
    %5 = vector.multi_reduction <add>, %4, %cst [2] : vector<2x8x50xf32> to vector<2x8xf32>
    %6 = vector.shape_cast %5 : vector<2x8xf32> to vector<2x8x1xf32>
    %cst_4 = arith.constant dense<0xFF800000> : vector<2x1xf32>
    %7 = vector.multi_reduction <maximumf>, %6, %cst_4 [1] : vector<2x8x1xf32> to vector<2x1xf32>
    %8 = vector.shape_cast %7 : vector<2x1xf32> to vector<2x1x1xf32>
    %9 = vector.broadcast %8 : vector<2x1x1xf32> to vector<2x8x1xf32>
    %10 = arith.subf %6, %9 : vector<2x8x1xf32>
    %11 = math.exp %10 : vector<2x8x1xf32>
    %cst_5 = arith.constant dense<0.000000e+00> : vector<2x1xf32>
    %12 = vector.multi_reduction <add>, %11, %cst_5 [1] : vector<2x8x1xf32> to vector<2x1xf32>
    %13 = vector.shape_cast %12 : vector<2x1xf32> to vector<2x1x1xf32>
    %14 = vector.broadcast %13 : vector<2x1x1xf32> to vector<2x8x1xf32>
    %15 = arith.divf %11, %14 : vector<2x8x1xf32>
    %16 = vector.broadcast %15 : vector<2x8x1xf32> to vector<2x8x50xf32>
    %17 = arith.mulf %16, %0 : vector<2x8x50xf32>
    %cst_6 = arith.constant dense<0.000000e+00> : vector<2x50xf32>
    %18 = vector.multi_reduction <add>, %17, %cst_6 [1] : vector<2x8x50xf32> to vector<2x50xf32>
    %c0_7 = arith.constant 0 : index
    %c0_8 = arith.constant 0 : index
    %c0_9 = arith.constant 0 : index
    %19 = vector.load %arg2[%c0_7, %c0_8, %c0_9] : memref<3x50x50xf32, #tpu.memory_space<vmem>>, vector<1x50x50xf32>
    %20 = vector.shape_cast %19 : vector<1x50x50xf32> to vector<50x50xf32>
    %cst_10 = arith.constant dense<0.000000e+00> : vector<2x50xf32>
    %21 = tpu.matmul %18, %20, %cst_10 {dimension_numbers = #tpu.dot_dimension_numbers<[1], [0], [0], [1], [0, 0, 1, 1], [], []>} : vector<2x50xf32>, vector<50x50xf32>, vector<2x50xf32> -> vector<2x50xf32>
    %c1 = arith.constant 1 : index
    %c0_11 = arith.constant 0 : index
    %22 = vector.load %arg1[%c1, %c0_11] : memref<5x50xf32, #tpu.memory_space<vmem>>, vector<1x50xf32>
    %23 = vector.broadcast %22 : vector<1x50xf32> to vector<2x50xf32>
    %24 = arith.addf %21, %23 : vector<2x50xf32>
    %cst_12 = arith.constant 0.000000e+00 : f32
    %25 = vector.broadcast %cst_12 : f32 to vector<2x50xf32>
    %26 = arith.maximumf %24, %25 : vector<2x50xf32>
    %c1_13 = arith.constant 1 : index
    %c0_14 = arith.constant 0 : index
    %c0_15 = arith.constant 0 : index
    %27 = vector.load %arg2[%c1_13, %c0_14, %c0_15] : memref<3x50x50xf32, #tpu.memory_space<vmem>>, vector<1x50x50xf32>
    %28 = vector.shape_cast %27 : vector<1x50x50xf32> to vector<50x50xf32>
    %cst_16 = arith.constant dense<0.000000e+00> : vector<2x50xf32>
    %29 = tpu.matmul %26, %28, %cst_16 {dimension_numbers = #tpu.dot_dimension_numbers<[1], [0], [0], [1], [0, 0, 1, 1], [], []>} : vector<2x50xf32>, vector<50x50xf32>, vector<2x50xf32> -> vector<2x50xf32>
    %c2 = arith.constant 2 : index
    %c0_17 = arith.constant 0 : index
    %30 = vector.load %arg1[%c2, %c0_17] : memref<5x50xf32, #tpu.memory_space<vmem>>, vector<1x50xf32>
    %31 = vector.broadcast %30 : vector<1x50xf32> to vector<2x50xf32>
    %32 = arith.addf %29, %31 : vector<2x50xf32>
    %cst_18 = arith.constant 0.000000e+00 : f32
    %33 = vector.broadcast %cst_18 : f32 to vector<2x50xf32>
    %34 = arith.maximumf %32, %33 : vector<2x50xf32>
    %c2_19 = arith.constant 2 : index
    %c0_20 = arith.constant 0 : index
    %c0_21 = arith.constant 0 : index
    %35 = vector.load %arg2[%c2_19, %c0_20, %c0_21] : memref<3x50x50xf32, #tpu.memory_space<vmem>>, vector<1x50x50xf32>
    %36 = vector.shape_cast %35 : vector<1x50x50xf32> to vector<50x50xf32>
    %cst_22 = arith.constant dense<0.000000e+00> : vector<2x50xf32>
    %37 = tpu.matmul %34, %36, %cst_22 {dimension_numbers = #tpu.dot_dimension_numbers<[1], [0], [0], [1], [0, 0, 1, 1], [], []>} : vector<2x50xf32>, vector<50x50xf32>, vector<2x50xf32> -> vector<2x50xf32>
    %c3 = arith.constant 3 : index
    %c0_23 = arith.constant 0 : index
    %38 = vector.load %arg1[%c3, %c0_23] : memref<5x50xf32, #tpu.memory_space<vmem>>, vector<1x50xf32>
    %39 = vector.broadcast %38 : vector<1x50xf32> to vector<2x50xf32>
    %40 = arith.addf %37, %39 : vector<2x50xf32>
    %cst_24 = arith.constant 0.000000e+00 : f32
    %41 = vector.broadcast %cst_24 : f32 to vector<2x50xf32>
    %42 = arith.maximumf %40, %41 : vector<2x50xf32>
    %c0_25 = arith.constant 0 : index
    %c0_26 = arith.constant 0 : index
    %43 = vector.load %arg3[%c0_25, %c0_26] : memref<50x1xf32, #tpu.memory_space<vmem>>, vector<50x1xf32>
    %cst_27 = arith.constant dense<0.000000e+00> : vector<2x1xf32>
    %44 = tpu.matmul %42, %43, %cst_27 {dimension_numbers = #tpu.dot_dimension_numbers<[1], [0], [0], [1], [0, 0, 1, 1], [], []>} : vector<2x50xf32>, vector<50x1xf32>, vector<2x1xf32> -> vector<2x1xf32>
    %c4 = arith.constant 4 : index
    %c0_28 = arith.constant 0 : index
    %45 = vector.load %arg1[%c4, %c0_28] : memref<5x50xf32, #tpu.memory_space<vmem>>, vector<1x1xf32>
    %46 = vector.broadcast %45 : vector<1x1xf32> to vector<2x1xf32>
    %47 = arith.addf %44, %46 : vector<2x1xf32>
    %48 = arith.negf %47 : vector<2x1xf32>
    %49 = math.exp %48 : vector<2x1xf32>
    %cst_29 = arith.constant 1.000000e+00 : f32
    %50 = vector.broadcast %cst_29 : f32 to vector<2x1xf32>
    %51 = arith.addf %50, %49 : vector<2x1xf32>
    %52 = arith.divf %50, %51 : vector<2x1xf32>
    %c0_30 = arith.constant 0 : index
    %c0_31 = arith.constant 0 : index
    %53 = vector.load %arg4[%c0_30, %c0_31] : memref<2x1xf32, #tpu.memory_space<vmem>>, vector<2x1xf32>
    tpu.vector_store %arg4[%c0_30, %c0_31], %52 {strides = array<i32>} : memref<2x1xf32, #tpu.memory_space<vmem>>, vector<2x1xf32>,
    return
  }
}

</mosaic_0001>

<bundles_post_ra>
// kernel: tpu_custom_call.1
= control target key start
LH: loop header
LB: loop body
LE: loop exit
PB: predicated region body
PF: predicated region fallthrough
CT: control target
= control target key end

     0   :  { %9 = vsyncpa [#allocation3], 0  ;;  %s352_s18 = smov [#allocation2]   ;;  %s353_s20 = smov 128   ;;  %s448_s0 = inlined_call_operand.vmem [shape: f32[2,8,50], index: 0, kind: input, shape index: {}]   ;;  %s449_s1 = inlined_call_operand.vmem [shape: f32[5,50], index: 1, kind: input, shape index: {}]   ;;  %s450_s2 = inlined_call_operand.hbm [shape: f32[3,50,50], index: 2, kind: input, shape index: {}]   ;;  %s451_s3 = inlined_call_operand.vmem [shape: f32[50,1], index: 3, kind: input, shape index: {}]   ;;  %s452_s4 = inlined_call_operand.vmem [shape: f32[2,1], index: 4, kind: output, shape index: {}]  }
   0x1   :  { %s18_s17 = sshll.u32 %s450_s2, 4  ;;  %s20_s19 = sshll.u32 %s352_s18, 4  ;;  %s19_s17 = int_to_ptr.hbm [resolvable:$true] %s18_s17  ;;  %s21_s19 = int_to_ptr.vmem [resolvable:$true] %s20_s19 }
   0x2   :  { %s354_s21 = smov 8  }
   0x3   :  { %26 = dma.hbm_to_vmem [thread:$0]  %s19_s17, 2688, %s21_s19, [#allocation3], %s353_s20, %s353_s20, %s354_s21  }
   0x4   :  { %350 = dma.done.wait [#allocation3], 2688  }
   0x5   :  { %351 = vsyncadd [#allocation3], 4294964608  ;;  %v386_v0 = vld [vmem:[%s448_s0] sm:$0xff]  ;;  %vm39_vm0 = vcmask 408576   ;;  %v395_v3 = vld [vmem:[%s448_s0 + $0x8] sm:$0xff]  ;;  %vm137_vm1 = vcmask 1041408  }
   0x6   :  { %v309_v1 = vld [vmem:[%s449_s1] ss:$0 sm:$0xff]  ;;  %v128_v17 = vld [vmem:[#allocation2 + $0x30] sm:$0x3]  ;;  %v127_v18 = vld [vmem:[#allocation2 + $0x28] sm:$0xff]  ;;  %vm133_vm10 = vcmask 1041409  }
   0x7   :  { %v37_v2 = vmul.f32 %v309_v1, %v386_v0  ;;  %v38_v5 = vmul.f32 %v309_v1, %v395_v3  ;;  %297 = vmatpush.msk.msra.mxu0 %vm137_vm1, %v128_v17  ;;  %v126_v21 = vld [vmem:[#allocation2 + $0x20] sm:$0xff]  ;;  %v125_v24 = vld [vmem:[#allocation2 + $0x18] sm:$0xff]  ;;  %v124_v26 = vld [vmem:[#allocation2 + $0x10] sm:$0xff]  ;;  %vm290_vm14 = vcmask 1024  }
   0x8   :  { %v123_v28 = vld [vmem:[#allocation2 + $0x8] sm:$0xff]  ;;  %v122_v30 = vld [vmem:[#allocation2] sm:$0xff]  ;;  %v167_v55 = vld [vmem:[#allocation2 + $0x58] sm:$0xff] }
   0x9   :  { %v40_v4 = vsel %vm39_vm0, %v37_v2, 0.0  ;;  %v43_v6 = vsel %vm39_vm0, %v38_v5, 0.0  ;;  %151 = vmatpush.msra.mxu0 %v127_v18  ;;  %v169_v52 = vld [vmem:[#allocation2 + $0x68] sm:$0x3]  ;;  %v168_v53 = vld [vmem:[#allocation2 + $0x60] sm:$0xff]  ;;  %v166_v60 = vld [vmem:[#allocation2 + $0x50] sm:$0xff] }
   0xa   :  { %41 = vadd.xlane.f32.xlu0 %v40_v4  ;;  %299 = vmatpush.msk.msra.mxu1 %vm137_vm1, %v169_v52 }
   0xb   :  { %152 = vmatpush.msra.mxu0 %v126_v21 }
   0xc   :  { %188 = vmatpush.msra.mxu1 %v168_v53 }
   0xd   :  { %153 = vmatpush.msra.mxu0 %v125_v24 }
   0xe   :  { %189 = vmatpush.msra.mxu1 %v167_v55 }
   0xf   :  { %154 = vmatpush.msra.mxu0 %v124_v26  ;;  %v165_v26 = vld [vmem:[#allocation2 + $0x48] sm:$0xff] }
  0x10   :  { %190 = vmatpush.msra.mxu1 %v166_v60 }
  0x11   :  { %155 = vmatpush.msra.mxu0 %v123_v28  ;;  %v206_v28 = vld [vmem:[#allocation2 + $0xa0] sm:$0x3] }
  0x12   :  { %44 = vadd.xlane.f32.xlu0 %v43_v6  ;;  %191 = vmatpush.msra.mxu1 %v165_v26 }
  0x13   :  { %156 = vmatpush.msra.mxu0 %v122_v30  ;;  %301 = vmatpush.msk.msra.mxu2 %vm137_vm1, %v206_v28  ;;  %v204_v30 = vld [vmem:[#allocation2 + $0x90] sm:$0xff] }
  0x7d   :  { %v42_v7 = vpop.xlane.xlu0 %41 }
  0x7e   :  { %v46_v8 = vrot.slane %v42_v7, 4 }
  0x80   :  { %v47_v9 = vmax.f32 %v42_v7, %v46_v8 }
  0x82   :  { %v48_v10 = vrot.slane %v47_v9, 2 }
  0x84   :  { %v49_v11 = vmax.f32 %v47_v9, %v48_v10 }
  0x85   :  { %v45_v12 = vpop.xlane.xlu0 %44 }
  0x86   :  { %v50_v13 = vrot.slane %v49_v11, 1  ;;  %v52_v14 = vrot.slane %v45_v12, 4 }
  0x88   :  { %v51_v15 = vmax.f32 %v49_v11, %v50_v13  ;;  %v53_v16 = vmax.f32 %v45_v12, %v52_v14 }
  0x8a   :  { %v58_v19 = vsub.f32 %v42_v7, %v51_v15  ;;  %v54_v20 = vrot.slane %v53_v16, 2 }
  0x8c   :  { %v60_v22 = vmul.f32 1.442695, %v58_v19  ;;  %v55_v23 = vmax.f32 %v53_v16, %v54_v20 }
  0x8e   :  { %314 = vpow2.f32 %v60_v22  ;;  %v56_v25 = vrot.slane %v55_v23, 1 }
  0x90   :  { %v57_v27 = vmax.f32 %v55_v23, %v56_v25 }
  0x92   :  { %v59_v29 = vsub.f32 %v45_v12, %v57_v27  ;;  %v164_v27 = vld [vmem:[#allocation2 + $0x40] sm:$0xff] }
  0x93   :  { %192 = vmatpush.msra.mxu1 %v164_v27 }
  0x94   :  { %v315_v31 = vpop.eup %314  ;;  %v62_v32 = vmul.f32 1.442695, %v59_v29  ;;  %v205_v29 = vld [vmem:[#allocation2 + $0x98] sm:$0xff] }
  0x95   :  { %v64_v33 = vrot.slane %v315_v31, 4  ;;  %225 = vmatpush.msra.mxu2 %v205_v29 }
  0x96   :  { %316 = vpow2.f32 %v62_v32  ;;  %v310_v32 = vld [vmem:[%s449_s1 + $0x1] ss:$0 sm:$0xff] }
  0x97   :  { %v65_v34 = vadd.f32 %v315_v31, %v64_v33  ;;  %226 = vmatpush.msra.mxu2 %v204_v30 }
  0x99   :  { %v66_v35 = vrot.slane %v65_v34, 2 }
  0x9b   :  { %v67_v36 = vadd.f32 %v66_v35, %v65_v34 }
  0x9c   :  { %v317_v37 = vpop.eup %316 }
  0x9d   :  { %v68_v38 = vrot.slane %v67_v36, 1  ;;  %v70_v39 = vrot.slane %v317_v37, 4 }
  0x9f   :  { %v69_v40 = vadd.f32 %v68_v38, %v67_v36  ;;  %v71_v41 = vadd.f32 %v317_v37, %v70_v39  ;;  %v202_v36 = vld [vmem:[#allocation2 + $0x80] sm:$0xff]  ;;  %v200_v38 = vld [vmem:[#allocation2 + $0x70] sm:$0xff] }
  0xa0   :  { %v242_v39 = vld [vmem:[%s451_s3 + $0x30] sm:$0x3] }
  0xa1   :  { %318 = vrcp.f32 %v69_v40  ;;  %v72_v42 = vrot.slane %v71_v41, 2  ;;  %v87_v49 = vand.u32 2147483648, %v69_v40  ;;  %v85_v51 = vand.u32 2147483647, %v69_v40  ;;  %303 = vmatpush.msk.msra.mxu3 %vm137_vm1, %v242_v39 }
  0xa2   :  { %vm81_vm3 = vweird.f32 %v69_v40 }
  0xa3   :  { %v73_v43 = vadd.f32 %v72_v42, %v71_v41  ;;  %v88_v57 = vor.u32 1.1754944e-38, %v87_v49  ;;  %vm86_vm5 = vcmp.eq.f32.partialorder %v85_v51, 8.507059e+37  ;;  %v240_v41 = vld [vmem:[%s451_s3 + $0x20] sm:$0xff]  ;;  %v239_v42 = vld [vmem:[%s451_s3 + $0x18] sm:$0xff] }
  0xa4   :  { %v236_v49 = vld [vmem:[%s451_s3] sm:$0xff] }
  0xa5   :  { %v74_v44 = vrot.slane %v73_v43, 1 }
  0xa7   :  { %v319_v45 = vpop.eup %318  ;;  %v75_v46 = vadd.f32 %v74_v44, %v73_v43  ;;  %v311_v43 = vld [vmem:[%s449_s1 + $0x2] ss:$0 sm:$0xff] }
  0xa8   :  { %v77_v47 = vmul.f32 %v319_v45, %v69_v40  ;;  %vm82_vm2 = vweird.f32 %v319_v45  ;;  %v241_v40 = vld [vmem:[%s451_s3 + $0x28] sm:$0xff] }
  0xa9   :  { %320 = vrcp.f32 %v75_v46  ;;  %vm83_vm4 = vmor %vm81_vm3, %vm82_vm2  ;;  %v102_v1 = vand.u32 2147483648, %v75_v46  ;;  %v100_v4 = vand.u32 2147483647, %v75_v46  ;;  %vm96_vm7 = vweird.f32 %v75_v46  ;;  %261 = vmatpush.msra.mxu3 %v241_v40 }
  0xaa   :  { %v78_v48 = vsub.f32 1.0, %v77_v47  ;;  %v238_v47 = vld [vmem:[%s451_s3 + $0x10] sm:$0xff] }
  0xab   :  { %v103_v8 = vor.u32 1.1754944e-38, %v102_v1  ;;  %vm101_vm9 = vcmp.eq.f32.partialorder %v100_v4, 8.507059e+37  ;;  %262 = vmatpush.msra.mxu3 %v240_v41 }
  0xac   :  { %v79_v50 = vmul.f32 %v319_v45, %v78_v48  ;;  %v237_v48 = vld [vmem:[%s451_s3 + $0x8] sm:$0xff] }
  0xad   :  { %263 = vmatpush.msra.mxu3 %v239_v42 }
  0xae   :  { %v80_v54 = vadd.f32 %v319_v45, %v79_v50  ;;  %v312_v50 = vld [vmem:[%s449_s1 + $0x3] ss:$0 sm:$0xff] }
  0xaf   :  { %v321_v56 = vpop.eup %320  ;;  %264 = vmatpush.msra.mxu3 %v238_v47 }
  0xb0   :  { %v84_v58 = vsel %vm83_vm4, %v319_v45, %v80_v54  ;;  %v92_v59 = vmul.f32 %v321_v56, %v75_v46  ;;  %vm97_vm6 = vweird.f32 %v321_v56  ;;  %v313_v54 = vld [vmem:[%s449_s1 + $0x4] ss:$0 sm:$0xff] }
  0xb1   :  { %v89_v61 = vsel %vm86_vm5, %v88_v57, %v84_v58  ;;  %vm98_vm8 = vmor %vm96_vm7, %vm97_vm6  ;;  %265 = vmatpush.msra.mxu3 %v237_v48 }
  0xb2   :  { %v90_v62 = vmul.f32 %v315_v31, %v89_v61  ;;  %v93_v63 = vsub.f32 1.0, %v92_v59  ;;  %v203_v31 = vld [vmem:[#allocation2 + $0x88] sm:$0xff] }
  0xb3   :  { %227 = vmatpush.msra.mxu2 %v203_v31  ;;  %266 = vmatpush.msra.mxu3 %v236_v49 }
  0xb4   :  { %v94_v2 = vmul.f32 %v321_v56, %v93_v63  ;;  %v106_v5 = vmul.f32 %v90_v62, %v386_v0 }
  0xb5   :  { %228 = vmatpush.msra.mxu2 %v202_v36 }
  0xb6   :  { %v95_v6 = vadd.f32 %v321_v56, %v94_v2  ;;  %v108_v7 = vsel %vm39_vm0, %v106_v5, 0.0 }
  0xb7   :  { %v109_v9 = vrot.slane %v108_v7, 4 }
  0xb8   :  { %v99_v10 = vsel %vm98_vm8, %v321_v56, %v95_v6 }
  0xb9   :  { %v104_v11 = vsel %vm101_vm9, %v103_v8, %v99_v10  ;;  %v110_v12 = vadd.f32 %v109_v9, %v108_v7 }
  0xba   :  { %v105_v13 = vmul.f32 %v317_v37, %v104_v11  ;;  %v201_v37 = vld [vmem:[#allocation2 + $0x78] sm:$0xff] }
  0xbb   :  { %v111_v15 = vrot.slane %v110_v12, 2  ;;  %229 = vmatpush.msra.mxu2 %v201_v37 }
  0xbc   :  { %v107_v14 = vmul.f32 %v105_v13, %v395_v3  ;;  %v163_v3 = vld [vmem:[#allocation2 + $0x38] sm:$0xff] }
  0xbd   :  { %v112_v18 = vadd.f32 %v111_v15, %v110_v12  ;;  %193 = vmatpush.msra.mxu1 %v163_v3  ;;  %230 = vmatpush.msra.mxu2 %v200_v38 }
  0xbe   :  { %v115_v16 = vsel %vm39_vm0, %v107_v14, 0.0 }
  0xbf   :  { %v116_v17 = vrot.slane %v115_v16, 4  ;;  %v113_v20 = vrot.slane %v112_v18, 1 }
  0xc1   :  { %v117_v0 = vadd.f32 %v116_v17, %v115_v16  ;;  %v114_v23 = vadd.f32 %v113_v20, %v112_v18 }
  0xc3   :  { %v118_v19 = vrot.slane %v117_v0, 2 }
  0xc5   :  { %v119_v21 = vadd.f32 %v118_v19, %v117_v0 }
  0xc7   :  { %v120_v22 = vrot.slane %v119_v21, 1 }
  0xc9   :  { %v121_v24 = vadd.f32 %v120_v22, %v119_v21 }
  0xcb   :  { %v134_v25 = vsel %vm133_vm10, %v121_v24, %v114_v23 }
  0xcc   :  { %298 = vmatmul.msk.f32.vlgmr.msra.gmra.mxu0 %vm39_vm0, %v134_v25 }
 0x149   :  { %v158_v33 = vpop.f32.mrf.mxu0 }
 0x14a   :  { %v159_v34 = vadd.f32 %v310_v32, %v158_v33 }
 0x14c   :  { %v161_v35 = vmax.f32 %v159_v34, 0.0 }
 0x14e   :  { %300 = vmatmul.msk.f32.vlgmr.msra.gmra.mxu1 %vm39_vm0, %v161_v35 }
 0x1cb   :  { %v195_v44 = vpop.f32.mrf.mxu1 }
 0x1cc   :  { %v196_v45 = vadd.f32 %v311_v43, %v195_v44 }
 0x1ce   :  { %v198_v46 = vmax.f32 %v196_v45, 0.0 }
 0x1d0   :  { %302 = vmatmul.msk.f32.vlgmr.msra.gmra.mxu2 %vm39_vm0, %v198_v46 }
 0x253   :  { %v232_v51 = vpop.f32.mrf.mxu2 }
 0x254   :  { %v233_v52 = vadd.f32 %v312_v50, %v232_v51 }
 0x256   :  { %v235_v53 = vmax.f32 %v233_v52, 0.0 }
 0x258   :  { %304 = vmatmul.msk.f32.vlgmr.msra.gmra.mxu3 %vm39_vm0, %v235_v53 }
 0x2db   :  { %v268_v55 = vpop.f32.mrf.mxu3 }
 0x2dc   :  { %v269_v56 = vadd.f32 %v313_v54, %v268_v55 }
 0x2de   :  { %v305_v57 = vmul.f32 -1.442695, %v269_v56 }
 0x2e0   :  { %322 = vpow2.f32 %v305_v57 }
 0x2e6   :  { %v323_v58 = vpop.eup %322 }
 0x2e7   :  { %v274_v59 = vadd.f32 1.0, %v323_v58 }
 0x2e9   :  { %324 = vrcp.f32 %v274_v59  ;;  %v286_v63 = vand.u32 2147483648, %v274_v59  ;;  %v284_v2 = vand.u32 2147483647, %v274_v59  ;;  %vm280_vm12 = vweird.f32 %v274_v59 }
 0x2eb   :  { %v287_v5 = vor.u32 1.1754944e-38, %v286_v63  ;;  %vm285_vm15 = vcmp.eq.f32.partialorder %v284_v2, 8.507059e+37 }
 0x2ef   :  { %v325_v60 = vpop.eup %324 }
 0x2f0   :  { %v276_v61 = vmul.f32 %v325_v60, %v274_v59  ;;  %vm281_vm11 = vweird.f32 %v325_v60 }
 0x2f1   :  { %vm282_vm13 = vmor %vm280_vm12, %vm281_vm11 }
 0x2f2   :  { %v277_v62 = vsub.f32 1.0, %v276_v61 }
 0x2f4   :  { %v278_v1 = vmul.f32 %v325_v60, %v277_v62 }
 0x2f6   :  { %v279_v4 = vadd.f32 %v325_v60, %v278_v1 }
 0x2f8   :  { %v283_v6 = vsel %vm282_vm13, %v325_v60, %v279_v4 }
 0x2f9   :  { %v288_v7 = vsel %vm285_vm15, %v287_v5, %v283_v6 }
 0x2fa   :  { %291 = vst.msk [vmem:[%s452_s4] sm:$0x3] %vm290_vm14, %v288_v7 }
 0x2fb   :  { %296 = vsyncpa [#allocation3], 1 }

</bundles_post_ra>
